<compile_context>
chip_gen: v6e
topology: v6e:2x2x1
jax: 0.10.0
libtpu: 0.0.40
codegen_flags: <defaults>
</compile_context>

<pallas_src>
import functools

import jax
import jax.numpy as jnp
from jax import lax
from jax.experimental import pallas as pl
from jax.experimental.pallas import tpu as pltpu


# ------------------------------ helpers --------------------------------------

def _round_up(x, m):
    return ((x + m - 1) // m) * m


def _pick_tile(size, target, align):
    """Largest divisor of `size` that is <= target and a multiple of `align`,
    falling back to the full extent (always legal per the (8,128) rule)."""
    if size <= target:
        return size
    t = (target // align) * align
    while t >= align:
        if size % t == 0:
            return t
        t -= align
    return size


def _vmem_limit_bytes():
    """Per-generation scoped-VMEM budget: ~3/4 of physical, capped at 96 MiB.
    v5e/v6e (128 MiB) -> 96 MiB; v7x (64 MiB) -> 48 MiB; fallback 48 MiB."""
    try:
        phys = pltpu.get_tpu_info().vmem_capacity_bytes
    except Exception:
        phys = 64 * 1024 * 1024
    return int(min((phys * 3) // 4, 96 * 1024 * 1024))


# ----------------------------- tiled matmul ----------------------------------

def _matmul_acc_kernel(x_ref, w_ref, o_ref, acc_ref):
    """One (tm, tn) output tile, accumulated in f32 over the K grid axis."""
    @pl.when(pl.program_id(2) == 0)
    def _():
        acc_ref[...] = jnp.zeros_like(acc_ref)

    acc_ref[...] += jnp.dot(
        x_ref[...], w_ref[...], preferred_element_type=jnp.float32
    )

    @pl.when(pl.program_id(2) == pl.num_programs(2) - 1)
    def _():
        o_ref[...] = acc_ref[...].astype(o_ref.dtype)


def tiled_matmul(x, w, *, tm_target=256, tn_target=512, tk_target=512,
                 out_dtype=None):
    """y = x @ w with K-accumulation, pipelined tiles sized for all TPU gens.
    Intended to be fed bf16 operands (f32 accumulation happens in-kernel)."""
    M, K = x.shape
    K2, N = w.shape
    assert K == K2
    out_dtype = out_dtype or x.dtype

    tm = _pick_tile(M, tm_target, 16)    # sublane-aligned (bf16 packs 2 rows)
    tn = _pick_tile(N, tn_target, 128)   # lane-aligned
    tk = _pick_tile(K, tk_target, 128)   # lane-aligned
    grid = (M // tm, N // tn, K // tk)

    return pl.pallas_call(
        _matmul_acc_kernel,
        out_shape=jax.ShapeDtypeStruct((M, N), out_dtype),
        grid_spec=pltpu.PrefetchScalarGridSpec(
            num_scalar_prefetch=0,
            grid=grid,
            in_specs=[
                pl.BlockSpec((tm, tk), lambda i, j, k: (i, k)),
                pl.BlockSpec((tk, tn), lambda i, j, k: (k, j)),
            ],
            out_specs=pl.BlockSpec((tm, tn), lambda i, j, k: (i, j)),
            scratch_shapes=[pltpu.VMEM((tm, tn), jnp.float32)],
        ),
        compiler_params=pltpu.CompilerParams(
            dimension_semantics=("parallel", "parallel", "arbitrary"),
            vmem_limit_bytes=_vmem_limit_bytes(),
        ),
    )(x, w)


# --------------------- fused attention + output projection -------------------

def _fused_attn_proj_kernel(qkv_ref, w_out_ref, b_out_ref, o_ref, attn_ref, *,
                            heads, dim_head, scale, tq, seq_len):
    """One (batch, query-tile) step: multi-head attention for tq query rows,
    head merge via a bf16 VMEM scratch slab, output projection + bias.

    qkv_ref  : (1, n_pad, 3*inner) bf16 block in 'b n (h d)' layout
               (resident across query tiles of the same batch element)
    w_out_ref: (inner, dim)  bf16
    b_out_ref: (1, dim)      f32
    o_ref    : (1, tq, dim)
    attn_ref : (tq, inner)   bf16 VMEM scratch (per-head outputs land here)
    """
    inner = heads * dim_head
    n_pad = qkv_ref.shape[1]
    q_start = pl.multiple_of(pl.program_id(1) * tq, tq)

    for h in range(heads):  # static unroll; ref slices are zero-cost views
        q = qkv_ref[0, pl.ds(q_start, tq), pl.ds(h * dim_head, dim_head)]
        k = qkv_ref[0, :, pl.ds(inner + h * dim_head, dim_head)]
        v = qkv_ref[0, :, pl.ds(2 * inner + h * dim_head, dim_head)]

        # Fold the softmax scale into q (tq*d mults instead of tq*n).
        q = (q.astype(jnp.float32) * scale).astype(jnp.bfloat16)

        # q @ k^T without materializing a transpose: contract last dims (MXU,
        # bf16 operands, f32 accumulation).
        s = lax.dot_general(
            q, k,
            dimension_numbers=(((1,), (1,)), ((), ())),
            preferred_element_type=jnp.float32,
        )  # (tq, n_pad) f32

        # Mask keys coming from sequence padding (static: only traced if padded).
        if n_pad > seq_len:
            key_idx = lax.broadcasted_iota(jnp.int32, s.shape, 1)
            s = jnp.where(key_idx < seq_len, s, jnp.float32(-1e30))

        # Numerically stable softmax over keys, normalization deferred to
        # after p@v (tq*d mults instead of tq*n) via the EUP approx reciprocal.
        m = jnp.max(s, axis=-1, keepdims=True)
        p = jnp.exp(s - m)
        l = jnp.sum(p, axis=-1, keepdims=True)

        out_h = jnp.dot(p.astype(jnp.bfloat16), v,
                        preferred_element_type=jnp.float32)   # (tq, dh) f32
        out_h = out_h * pl.reciprocal(l, approx=True)

        # 'b h n d -> b n (h d)' merge: write this head's lane range into the
        # VMEM scratch slab (bounds live ranges; no concatenate copy).
        attn_ref[:, pl.ds(h * dim_head, dim_head)] = out_h.astype(jnp.bfloat16)

    # Single wide MXU matmul over the merged heads, bias added exactly once.
    y = jnp.dot(attn_ref[...], w_out_ref[...],
                preferred_element_type=jnp.float32)            # (tq, dim) f32
    y = y + b_out_ref[...].astype(jnp.float32)
    o_ref[0] = y.astype(o_ref.dtype)                           # (tq, dim) store


# ----------------------------- wrapper ---------------------------------------

def attention_forward(x, w_qkv, w_out, b_out, *, heads, dim_head):
    """Forward pass of the ViT Attention block.

    x:      (b, n, dim)
    w_qkv:  (dim, 3 * heads * dim_head)   -- to_qkv (bias=False)
    w_out:  (heads * dim_head, dim)       -- to_out Linear weight
    b_out:  (dim,)                        -- to_out Linear bias
    """
    b, n, dim = x.shape
    inner = heads * dim_head
    scale = dim_head ** (-0.5)
    out_dtype = x.dtype

    # ---- query tiling / sequence padding (keeps tiles aligned & grid deep) --
    tq_target = 128
    if n <= tq_target:
        tq = _round_up(n, 16)
        n_pad = tq
    else:
        tq = tq_target
        n_pad = _round_up(n, tq)
    n_q_tiles = n_pad // tq

    x_p = x
    if n_pad != n:
        x_p = jnp.pad(x, ((0, 0), (0, n_pad - n), (0, 0)))

    # bf16 MXU operands everywhere (f32 accumulation happens inside kernels).
    x_bf = x_p.astype(jnp.bfloat16).reshape(b * n_pad, dim)
    w_qkv_bf = w_qkv.astype(jnp.bfloat16)
    w_out_bf = w_out.astype(jnp.bfloat16)
    b_out_2d = b_out.reshape(1, dim).astype(jnp.float32)

    # ---- 1. QKV projection: tiled, pipelined bf16 matmul, bf16 intermediate -
    qkv = tiled_matmul(x_bf, w_qkv_bf, out_dtype=jnp.bfloat16)
    qkv3d = qkv.reshape(b, n_pad, 3 * inner)   # contiguous -> free reshape

    # ---- 2+3. Fused attention + output projection (Dropout p=0 == identity) -
    y = pl.pallas_call(
        functools.partial(_fused_attn_proj_kernel, heads=heads,
                          dim_head=dim_head, scale=scale, tq=tq, seq_len=n),
        out_shape=jax.ShapeDtypeStruct((b, n_pad, dim), out_dtype),
        grid_spec=pltpu.PrefetchScalarGridSpec(
            num_scalar_prefetch=0,
            grid=(b, n_q_tiles),
            in_specs=[
                # indexed by batch only -> resident across query tiles
                pl.BlockSpec((1, n_pad, 3 * inner), lambda i, j: (i, 0, 0)),
                pl.BlockSpec((inner, dim), lambda i, j: (0, 0)),
                pl.BlockSpec((1, dim), lambda i, j: (0, 0)),
            ],
            out_specs=pl.BlockSpec((1, tq, dim), lambda i, j: (i, j, 0)),
            scratch_shapes=[pltpu.VMEM((tq, inner), jnp.bfloat16)],
        ),
        compiler_params=pltpu.CompilerParams(
            dimension_semantics=("parallel", "parallel"),
            vmem_limit_bytes=_vmem_limit_bytes(),
        ),
    )(qkv3d, w_out_bf, b_out_2d)

    if n_pad != n:
        y = y[:, :n, :]
    return y


# ----------------------------- reference (pure JAX) ---------------------------

def attention_reference(x, w_qkv, w_out, b_out, *, heads, dim_head):
    b, n, dim = x.shape
    inner = heads * dim_head
    scale = dim_head ** (-0.5)
    qkv = x @ w_qkv
    q, k, v = jnp.split(qkv, 3, axis=-1)

    def sh(t):
        return t.reshape(b, n, heads, dim_head).transpose(0, 2, 1, 3)

    q, k, v = sh(q), sh(k), sh(v)
    dots = jnp.einsum("bhid,bhjd->bhij", q, k) * scale
    attn = jax.nn.softmax(dots, axis=-1)
    out = jnp.einsum("bhij,bhjd->bhid", attn, v)
    out = out.transpose(0, 2, 1, 3).reshape(b, n, inner)
    return out @ w_out + b_out


# ----------------------------- main -------------------------------------------

if __name__ == "__main__":
    # Small, forward-consistent shapes.
    batch, seq, dim = 2, 8, 32
    heads, dim_head = 4, 16
    inner = heads * dim_head

    key = jax.random.PRNGKey(0)
    kx, kqkv, kw, kb = jax.random.split(key, 4)

    x = jax.random.normal(kx, (batch, seq, dim), dtype=jnp.float32)
    # Deterministic synthetic parameters (shapes match nn.Linear in __init__).
    w_qkv = jax.random.normal(kqkv, (dim, 3 * inner), dtype=jnp.float32) * 0.02
    w_out = jax.random.normal(kw, (inner, dim), dtype=jnp.float32) * 0.02
    b_out = jax.random.normal(kb, (dim,), dtype=jnp.float32) * 0.02

    y = attention_forward(x, w_qkv, w_out, b_out, heads=heads, dim_head=dim_head)
    y = jax.block_until_ready(y)

    y_ref = attention_reference(x, w_qkv, w_out, b_out,
                                heads=heads, dim_head=dim_head)
    assert y.shape == (batch, seq, dim)
    # bf16 MXU operands -> loosened tolerance vs the f32 reference.
    assert jnp.allclose(y, y_ref, atol=2e-2, rtol=2e-2), "mismatch vs reference"

    print("KERNEL_OK")
</pallas_src>

<mosaic_0001>
module attributes {stable_mosaic.version = 11 : i64} {
  func.func @_matmul_acc_kernel(%arg0: i32, %arg1: i32, %arg2: i32, %arg3: memref<32x32xbf16, #tpu.memory_space<vmem>>, %arg4: memref<32x192xbf16, #tpu.memory_space<vmem>>, %arg5: memref<32x192xbf16, #tpu.memory_space<vmem>>, %arg6: memref<32x192xf32, #tpu.memory_space<vmem>>) attributes {dimension_semantics = [#tpu.dimension_semantics<parallel>, #tpu.dimension_semantics<parallel>, #tpu.dimension_semantics<arbitrary>], iteration_bounds = array<i64: 1, 1, 1>, scalar_prefetch = 0 : i64, scratch_operands = 1 : i64, tpu.core_type = #tpu.core_type<tc>, window_params = [{transform_indices = @transform_0, window_bounds = array<i64: 32, 32>}, {transform_indices = @transform_1, window_bounds = array<i64: 32, 192>}, {transform_indices = @transform_2, window_bounds = array<i64: 32, 192>}]} {
    %c0_i32 = arith.constant 0 : i32
    %0 = arith.cmpi eq, %arg2, %c0_i32 : i32
    %1 = arith.extui %0 : i1 to i32
    %c0_i32_0 = arith.constant 0 : i32
    %2 = arith.cmpi ne, %1, %c0_i32_0 : i32
    scf.if %2 {
      %cst_10 = arith.constant 0.000000e+00 : f32
      %12 = vector.broadcast %cst_10 : f32 to vector<32x192xf32>
      %c0_11 = arith.constant 0 : index
      %c0_12 = arith.constant 0 : index
      %13 = vector.load %arg6[%c0_11, %c0_12] : memref<32x192xf32, #tpu.memory_space<vmem>>, vector<32x192xf32>
      tpu.vector_store %arg6[%c0_11, %c0_12], %12 {strides = array<i32>} : memref<32x192xf32, #tpu.memory_space<vmem>>, vector<32x192xf32>,
    } else {
    }
    %c0 = arith.constant 0 : index
    %c0_1 = arith.constant 0 : index
    %3 = vector.load %arg6[%c0, %c0_1] : memref<32x192xf32, #tpu.memory_space<vmem>>, vector<32x192xf32>
    %c0_2 = arith.constant 0 : index
    %c0_3 = arith.constant 0 : index
    %4 = vector.load %arg3[%c0_2, %c0_3] : memref<32x32xbf16, #tpu.memory_space<vmem>>, vector<32x32xbf16>
    %c0_4 = arith.constant 0 : index
    %c0_5 = arith.constant 0 : index
    %5 = vector.load %arg4[%c0_4, %c0_5] : memref<32x192xbf16, #tpu.memory_space<vmem>>, vector<32x192xbf16>
    %cst = arith.constant dense<0.000000e+00> : vector<32x192xf32>
    %6 = tpu.matmul %4, %5, %cst {dimension_numbers = #tpu.dot_dimension_numbers<[1], [0], [0], [1], [0, 0, 1, 1], [], []>} : vector<32x32xbf16>, vector<32x192xbf16>, vector<32x192xf32> -> vector<32x192xf32>
    %7 = arith.addf %3, %6 : vector<32x192xf32>
    %c0_6 = arith.constant 0 : index
    %c0_7 = arith.constant 0 : index
    %8 = vector.load %arg6[%c0_6, %c0_7] : memref<32x192xf32, #tpu.memory_space<vmem>>, vector<32x192xf32>
    tpu.vector_store %arg6[%c0_6, %c0_7], %7 {strides = array<i32>} : memref<32x192xf32, #tpu.memory_space<vmem>>, vector<32x192xf32>,
    %c0_i32_8 = arith.constant 0 : i32
    %9 = arith.cmpi eq, %arg2, %c0_i32_8 : i32
    %10 = arith.extui %9 : i1 to i32
    %c0_i32_9 = arith.constant 0 : i32
    %11 = arith.cmpi ne, %10, %c0_i32_9 : i32
    scf.if %11 {
      %c0_10 = arith.constant 0 : index
      %c0_11 = arith.constant 0 : index
      %12 = vector.load %arg6[%c0_10, %c0_11] : memref<32x192xf32, #tpu.memory_space<vmem>>, vector<32x192xf32>
      %13 = arith.truncf %12 : vector<32x192xf32> to vector<32x192xbf16>
      %c0_12 = arith.constant 0 : index
      %c0_13 = arith.constant 0 : index
      %14 = vector.load %arg5[%c0_12, %c0_13] : memref<32x192xbf16, #tpu.memory_space<vmem>>, vector<32x192xbf16>
      tpu.vector_store %arg5[%c0_12, %c0_13], %13 {strides = array<i32>} : memref<32x192xbf16, #tpu.memory_space<vmem>>, vector<32x192xbf16>,
    } else {
    }
    return
  }
  func.func @transform_0(%arg0: i32, %arg1: i32, %arg2: i32) -> (i32, i32) {
    %c0_i32 = arith.constant 0 : i32
    return %arg0, %arg2 : i32, i32
  }
  func.func @transform_1(%arg0: i32, %arg1: i32, %arg2: i32) -> (i32, i32) {
    %c0_i32 = arith.constant 0 : i32
    return %arg2, %arg1 : i32, i32
  }
  func.func @transform_2(%arg0: i32, %arg1: i32, %arg2: i32) -> (i32, i32) {
    %c0_i32 = arith.constant 0 : i32
    return %arg0, %arg1 : i32, i32
  }
}

</mosaic_0001>

<bundles_post_ra>
// kernel: tpu_custom_call.1
= control target key start
LH: loop header
LB: loop body
LE: loop exit
PB: predicated region body
PF: predicated region fallthrough
CT: control target
= control target key end

     0   :  { %7 = vsyncpa [#allocation4], 0  ;;  %s387_s0 = inlined_call_operand.hbm [shape: bf16[32,32], index: 0, kind: input, shape index: {}]   ;;  %s388_s1 = inlined_call_operand.hbm [shape: bf16[32,192], index: 1, kind: input, shape index: {}]   ;;  %s389_s2 = inlined_call_operand.hbm [shape: bf16[32,192], index: 2, kind: output, shape index: {}]  }
   0x1   :  { %8 = vsyncpa [#allocation7], 0 }
   0x2   :  { %9 = vsyncpa [#allocation5], 0  ;;  %s340_s9 = smov [#allocation3]  }
   0x3   :  { %s15_s10 = sshll.u32 %s340_s9, 4  ;;  %s16_s10 = int_to_ptr.vmem [resolvable:$true] %s15_s10 }
   0x4   :  { %s282_s11 = scalar_lea.vmem %s16_s10, 256  ;;  %p287_p1 = scmp.lt.s32.totalorder %s16_s10, %s16_s10 }
   0x5   :  { %p283_p0 = scmp.ne.s32.totalorder %s16_s10, %s282_s11  ;;  %p288_p2 = scmp.lt.s32.totalorder %s282_s11, %s282_s11 }
   0x7   :  { %p289_p3 = por %p288_p2, %p287_p1 }
   0x9   :  { %p290_p4 = pnand %p289_p3, %p283_p0 }
   0xb   :  { %293 = shalt.err (!%p290_p4)
}
   0xc   :  { %s341_s12 = smov 64   ;;  %s342_s13 = smov 4  }
   0xd   :  { %21 = dma.hbm_to_vmem [thread:$0]  %s387_s0, 256, %s16_s10, [#allocation4], %s341_s12, %s341_s12, %s342_s13  }
   0xe   :  { %s343_s16 = smov [#allocation6]  }
   0xf   :  { %s27_s17 = sshll.u32 %s343_s16, 4  ;;  %s28_s17 = int_to_ptr.vmem [resolvable:$true] %s27_s17 }
  0x10   :  { %s302_s18 = scalar_lea.vmem %s28_s17, 512  ;;  %p307_p6 = scmp.lt.s32.totalorder %s28_s17, %s28_s17 }
  0x11   :  { %p303_p5 = scmp.ne.s32.totalorder %s28_s17, %s302_s18  ;;  %p308_p7 = scmp.lt.s32.totalorder %s302_s18, %s302_s18 }
  0x13   :  { %p309_p8 = por %p308_p7, %p307_p6 }
  0x15   :  { %p310_p9 = pnand %p309_p8, %p303_p5 }
  0x17   :  { %313 = shalt.err (!%p310_p9)
}
  0x18   :  { %s344_s19 = smov 128   ;;  %s345_s20 = smov 8  }
  0x19   :  { %33 = dma.hbm_to_vmem [thread:$0]  %s388_s1, 512, %s28_s17, [#allocation7], %s344_s19, %s344_s19, %s345_s20  }
  0x1a   :  { %334 = dma.done.wait [#allocation4], 256  }
  0x1b   :  { %335 = vsyncadd [#allocation4], 4294967040 }
  0x1c   :  { %336 = dma.done.wait [#allocation7], 512  }
  0x1d   :  { %337 = vsyncadd [#allocation7], 4294966784  ;;  %v346_v0 = vmov 0   ;;  %v266_v1 = vld [vmem:[#allocation6 + $0x14] ss:$8 sps:$4 sm:$0xff]   ;;  %vm100_vm0 = vcmask 261120  }
  0x1e   :  { %139 = vmatprep.mubr.bf16.mxu0 %v346_v0  ;;  %149 = vmatprep.mubr.bf16.mxu1 %v346_v0  ;;  %v268_v2 = vld [vmem:[#allocation6 + $0x10] ss:$8 sps:$4 sm:$0xff]   ;;  %v269_v3 = vld [vmem:[#allocation6 + $0x4] ss:$8 sps:$4 sm:$0xff]   ;;  %v271_v4 = vld [vmem:[#allocation6] ss:$8 sps:$4 sm:$0xff]  }
  0x1f   :  { %119 = vmatprep.subr.bf16.mxu0 %v266_v1  ;;  %253 = vmatprep.subr.bf16.mxu1 %v266_v1  ;;  %v272_v5 = vld [vmem:[#allocation3] sm:$0xff]   ;;  %v273_v6 = vld [vmem:[#allocation3 + $0x8] sm:$0xff]   ;;  %vm46_vm1 = vcmask 523264   ;;  %v347_v7 = vmov 0.0   ;;  %vm212_vm2 = vcmask 1043456   ;;  %vm213_vm3 = vcmask 523268  }
  0x20   :  { %120 = vmatpush1.bf16.msra.mxu0 %v268_v2  ;;  %255 = vmatpush1.bf16.msra.mxu1 %v268_v2  ;;  %47 = vst.msk [vmem:[#allocation2 + $0x8] sm:$0xff] %vm46_vm1, %v347_v7  ;;  %49 = vst.msk [vmem:[#allocation2 + $0x18] sm:$0xff] %vm46_vm1, %v347_v7  ;;  %s348_s0 = smov [#allocation8]  }
  0x21   :  { %121 = vmatprep.subr.bf16.mxu0 %v269_v3  ;;  %254 = vmatprep.subr.bf16.mxu1 %v269_v3  ;;  %51 = vst.msk [vmem:[#allocation2 + $0x28] sm:$0xff] %vm46_vm1, %v347_v7  ;;  %53 = vst.msk [vmem:[#allocation2 + $0x38] sm:$0xff] %vm46_vm1, %v347_v7  ;;  %s224_s1 = sshll.u32 %s348_s0, 4  ;;  %s225_s1 = int_to_ptr.vmem [resolvable:$true] %s224_s1 }
  0x22   :  { %vm214_vm4 = vmor %vm213_vm3, %vm212_vm2  ;;  %s314_s23 = scalar_lea.vmem %s225_s1, 512  ;;  %p319_p11 = scmp.lt.s32.totalorder %s225_s1, %s225_s1 }
  0x23   :  { %p315_p10 = scmp.ne.s32.totalorder %s225_s1, %s314_s23  ;;  %p320_p12 = scmp.lt.s32.totalorder %s314_s23, %s314_s23 }
  0x24   :  { %122 = vmatpush1.bf16.msra.mxu0 %v271_v4  ;;  %256 = vmatpush1.bf16.msra.mxu1 %v271_v4 }
  0x25   :  { %p321_p13 = por %p320_p12, %p319_p11 }
  0x27   :  { %243 = vmatmul.mubr.msk.bf16.vlgmr.msra.gmra.mxu0 %vm100_vm0, %v272_v5  ;;  %244 = vmatmul.mubr.msk.bf16.vlgmr.msra.gmra.mxu1 %vm100_vm0, %v273_v6  ;;  %v55_v10 = vld [vmem:[#allocation2 + $0x8] sm:$0xff]  ;;  %v57_v18 = vld [vmem:[#allocation2 + $0x18] sm:$0xff]  ;;  %p322_p0 = pnand %p321_p13, %p315_p10 }
  0x28   :  { %v59_v11 = vld [vmem:[#allocation2 + $0x28] sm:$0xff]  ;;  %v61_v19 = vld [vmem:[#allocation2 + $0x38] sm:$0xff] }
  0xe7   :  { %v141_v8 = vpop.f32.mrf.mxu0  ;;  %v151_v9 = vpop.f32.mrf.mxu1 }
  0xe9   :  { %v143_v12 = vpop.f32.mrf.mxu0  ;;  %v153_v13 = vpop.f32.mrf.mxu1 }
  0xea   :  { %v161_v14 = vadd.f32 %v143_v12, %v55_v10  ;;  %v165_v15 = vadd.f32 %v153_v13, %v59_v11 }
  0xeb   :  { %v145_v16 = vpop.f32.mrf.mxu0  ;;  %v155_v17 = vpop.f32.mrf.mxu1 }
  0xec   :  { %170 = vst.msk [vmem:[#allocation2 + $0x8] sm:$0xff] %vm46_vm1, %v161_v14  ;;  %174 = vst.msk [vmem:[#allocation2 + $0x28] sm:$0xff] %vm46_vm1, %v165_v15 }
  0xed   :  { %v147_v20 = vpop.f32.mrf.mxu0  ;;  %v157_v21 = vpop.f32.mrf.mxu1 }
  0xee   :  { %v163_v22 = vadd.f32 %v147_v20, %v57_v18  ;;  %v167_v23 = vadd.f32 %v157_v21, %v61_v19 }
  0xf0   :  { %172 = vst.msk [vmem:[#allocation2 + $0x18] sm:$0xff] %vm46_vm1, %v163_v22  ;;  %176 = vst.msk [vmem:[#allocation2 + $0x38] sm:$0xff] %vm46_vm1, %v167_v23 }
  0xf3   :  { %v181_v24 = vld [vmem:[#allocation2 + $0x8] sm:$0xff] }
  0xf4   :  { %v185_v25 = vld [vmem:[#allocation2 + $0x28] sm:$0xff]  ;;  %v249_v26 = vpack.c.bf16 %v181_v24, %v141_v8 }
  0xf5   :  { %v251_v27 = vpack.c.bf16 %v185_v25, %v151_v9 }
  0xf6   :  { %215 = vst.msk [vmem:[#allocation8] sm:$0xff] %vm214_vm4, %v249_v26 }
  0xf7   :  { %217 = vst.msk [vmem:[#allocation8 + $0x10] sm:$0xff] %vm214_vm4, %v251_v27  ;;  %v183_v28 = vld [vmem:[#allocation2 + $0x18] sm:$0xff] }
  0xf8   :  { %v187_v29 = vld [vmem:[#allocation2 + $0x38] sm:$0xff]  ;;  %v250_v30 = vpack.c.bf16 %v183_v28, %v145_v16 }
  0xf9   :  { %v252_v31 = vpack.c.bf16 %v187_v29, %v155_v17 }
  0xfa   :  { %216 = vst.msk [vmem:[#allocation8 + $0x8] sm:$0xff] %vm214_vm4, %v250_v30 }
  0xfb   :  { %218 = vst.msk [vmem:[#allocation8 + $0x18] sm:$0xff] %vm214_vm4, %v252_v31 }
  0xfc   :  { %325 = shalt.err (!%p322_p0)
}
  0xfd   :  { %230 = dma.vmem_to_hbm [thread:$0]  %s225_s1, 512, %s389_s2, [#allocation5], %s344_s19, %s344_s19, %s345_s20  }
  0xfe   :  { %338 = dma.done.wait [#allocation5], 512  }
  0xff   :  { %339 = vsyncadd [#allocation5], 4294966784 }
 0x100   :  { %234 = vsyncpa [#allocation4], 1 }
 0x101   :  { %235 = vsyncpa [#allocation7], 1 }
 0x102   :  { %236 = vsyncpa [#allocation5], 1 }

</bundles_post_ra>
